<compile_context>
chip_gen: v5e
topology: v5e:2x2
jax: 0.10.0
libtpu: 0.0.40
codegen_flags: <defaults>
</compile_context>

<pallas_src>
import functools
import math

import jax
import jax.numpy as jnp
from jax.experimental import pallas as pl
from jax.experimental.pallas import tpu as pltpu


def _label_smoothing_kernel(x_ref, tgt_ref, out_ref, acc_ref, *,
                            padding_idx, smooth_val, confidence,
                            log_smooth, log_conf):
    i = pl.program_id(1)

    # Zero the full-tile accumulator at the start of this core's slice.
    @pl.when(i == 0)
    def _():
        acc_ref[...] = jnp.zeros_like(acc_ref)

    x = x_ref[...]                      # (tm, V) f32 log-probs
    tgt = tgt_ref[...]                  # (tm, 1) i32 labels
    col = jax.lax.broadcasted_iota(jnp.int32, x.shape, 1)

    # true_dist only ever holds {confidence, smooth_val, 0}. The logs are
    # trace-time constants, so the per-element KL term is pure VALU work.
    if smooth_val > 0.0:
        smooth_term = jnp.float32(smooth_val) * (jnp.float32(log_smooth) - x)
    else:
        smooth_term = jnp.zeros_like(x)
    if confidence > 0.0:
        conf_term = jnp.float32(confidence) * (jnp.float32(log_conf) - x)
    else:
        conf_term = jnp.zeros_like(x)

    kl = jnp.where(col == tgt, conf_term, smooth_term)
    kl = jnp.where(col == padding_idx, jnp.float32(0.0), kl)
    kl = jnp.where(tgt == padding_idx, jnp.float32(0.0), kl)

    # Per-step: VALU-only accumulate (fully hidden under the HBM DMA).
    acc_ref[...] += kl

    # Final step for this core: one cross-lane/sublane reduce + lane-dense store.
    @pl.when(i == pl.num_programs(1) - 1)
    def _():
        total = jnp.sum(acc_ref[...])
        out_ref[...] = jnp.full(out_ref.shape, total, dtype=out_ref.dtype)


def label_smoothing_loss(x, target, *, size, padding_idx, smoothing,
                         n_cores=2, vmem_budget_bytes=12 << 20):
    """x: (N, size) f32 log-probs; target: (N,) int. Returns scalar f32 loss."""
    N, V = x.shape
    assert V == size
    assert size > 2  # same assumption as the PyTorch original (smoothing/(size-2))
    confidence = 1.0 - smoothing
    smooth_val = smoothing / (size - 2)

    # --- Tile sizing: biggest row tile that keeps
    #       2 double-buffered x tiles + 1 f32 accumulator tile + 2 target tiles
    #     under the VMEM budget. Budget (12 MiB) + 32 MiB scoped limit fits the
    #     64 MiB-VMEM v7x as well as the 128 MiB v5e/v6e.
    V_pad = ((V + 127) // 128) * 128            # lane padding of a V-wide row
    bytes_per_row = 3 * V_pad * 4 + 2 * 128 * 4
    tm_cap = max(8, ((vmem_budget_bytes // bytes_per_row) // 8) * 8)
    tm_cap = min(tm_cap, 4096)

    rows_per_core = -(-N // n_cores)
    tm = min(tm_cap, ((rows_per_core + 7) // 8) * 8)
    K = -(-rows_per_core // tm)                 # grid steps per core
    N_pad = n_cores * K * tm

    if N_pad != N:
        # Padded rows get target == padding_idx, so they contribute exactly 0.
        x = jnp.pad(x, ((0, N_pad - N), (0, 0)))
        target = jnp.pad(target, (0, N_pad - N), constant_values=padding_idx)

    tgt2d = target.astype(jnp.int32).reshape(N_pad, 1)

    kernel = functools.partial(
        _label_smoothing_kernel,
        padding_idx=padding_idx,
        smooth_val=smooth_val,
        confidence=confidence,
        log_smooth=math.log(smooth_val) if smooth_val > 0.0 else 0.0,
        log_conf=math.log(confidence) if confidence > 0.0 else 0.0)

    out = pl.pallas_call(
        kernel,
        out_shape=jax.ShapeDtypeStruct((n_cores * 8, 128), jnp.float32),
        grid_spec=pltpu.PrefetchScalarGridSpec(
            num_scalar_prefetch=0,
            grid=(n_cores, K),
            in_specs=[
                pl.BlockSpec((tm, V), lambda c, i: (c * K + i, 0)),
                pl.BlockSpec((tm, 1), lambda c, i: (c * K + i, 0)),
            ],
            out_specs=pl.BlockSpec((8, 128), lambda c, i: (c, 0)),
            scratch_shapes=[pltpu.VMEM((tm, V), jnp.float32)],
        ),
        compiler_params=pltpu.CompilerParams(
            dimension_semantics=("parallel", "arbitrary"),
            vmem_limit_bytes=32 * 1024 * 1024),
        cost_estimate=pl.CostEstimate(
            flops=6 * N_pad * V,
            transcendentals=0,
            bytes_accessed=N_pad * V * 4 + N_pad * 4 + n_cores * 8 * 128 * 4),
    )(x, tgt2d)

    # Each core's (8,128) output block is filled with its partial sum; take one
    # element per block and add.
    return jnp.sum(out[::8, 0])


def _reference_loss(x, target, *, size, padding_idx, smoothing):
    """Pure-JAX reference mirroring the PyTorch module."""
    confidence = 1.0 - smoothing
    N, V = x.shape
    col = jnp.arange(V)[None, :]
    tgt = target[:, None]
    td = jnp.full((N, V), smoothing / (size - 2), dtype=x.dtype)
    td = jnp.where(col == tgt, confidence, td)
    td = td.at[:, padding_idx].set(0.0)
    td = jnp.where(tgt == padding_idx, 0.0, td)
    kl = jnp.where(td > 0.0, td * (jnp.log(td) - x), 0.0)
    return jnp.sum(kl)


if __name__ == "__main__":
    size = 32          # vocab size
    padding_idx = 0
    smoothing = 0.1
    N = 16             # number of (batch*seq) token positions

    key = jax.random.PRNGKey(0)
    k_logits, k_tgt = jax.random.split(key)

    logits = jax.random.normal(k_logits, (N, size), dtype=jnp.float32)
    x = jax.nn.log_softmax(logits, axis=-1)          # log-probabilities
    target = jax.random.randint(k_tgt, (N,), 0, size, dtype=jnp.int32)
    # Force a couple of padding targets so the row-masking path is exercised.
    target = target.at[3].set(padding_idx).at[11].set(padding_idx)

    loss = label_smoothing_loss(
        x, target, size=size, padding_idx=padding_idx, smoothing=smoothing)
    loss = jax.block_until_ready(loss)

    ref = _reference_loss(
        x, target, size=size, padding_idx=padding_idx, smoothing=smoothing)
    assert jnp.allclose(loss, ref, rtol=1e-5, atol=1e-5), (loss, ref)

    print("KERNEL_OK")
</pallas_src>

<mosaic_0001>
module attributes {stable_mosaic.version = 11 : i64} {
  func.func @_label_smoothing_kernel(%arg0: i32, %arg1: i32, %arg2: memref<8x32xf32, #tpu.memory_space<vmem>>, %arg3: memref<8x1xi32, #tpu.memory_space<vmem>>, %arg4: memref<8x128xf32, #tpu.memory_space<vmem>>, %arg5: memref<8x32xf32, #tpu.memory_space<vmem>>) attributes {dimension_semantics = [#tpu.dimension_semantics<parallel>, #tpu.dimension_semantics<arbitrary>], iteration_bounds = array<i64: 2, 1>, scalar_prefetch = 0 : i64, scratch_operands = 1 : i64, tpu.core_type = #tpu.core_type<tc>, window_params = [{transform_indices = @transform_0, window_bounds = array<i64: 8, 32>}, {transform_indices = @transform_1, window_bounds = array<i64: 8, 1>}, {transform_indices = @transform_2, window_bounds = array<i64: 8, 128>}]} {
    %c0_i32 = arith.constant 0 : i32
    %0 = arith.cmpi eq, %arg1, %c0_i32 : i32
    %1 = arith.extui %0 : i1 to i32
    %c0_i32_0 = arith.constant 0 : i32
    %2 = arith.cmpi ne, %1, %c0_i32_0 : i32
    scf.if %2 {
      %cst_17 = arith.constant 0.000000e+00 : f32
      %33 = vector.broadcast %cst_17 : f32 to vector<8x32xf32>
      %c0_18 = arith.constant 0 : index
      %c0_19 = arith.constant 0 : index
      %34 = vector.load %arg5[%c0_18, %c0_19] : memref<8x32xf32, #tpu.memory_space<vmem>>, vector<8x32xf32>
      tpu.vector_store %arg5[%c0_18, %c0_19], %33 {strides = array<i32>} : memref<8x32xf32, #tpu.memory_space<vmem>>, vector<8x32xf32>,
    } else {
    }
    %c0 = arith.constant 0 : index
    %c0_1 = arith.constant 0 : index
    %3 = vector.load %arg2[%c0, %c0_1] : memref<8x32xf32, #tpu.memory_space<vmem>>, vector<8x32xf32>
    %c0_2 = arith.constant 0 : index
    %c0_3 = arith.constant 0 : index
    %4 = vector.load %arg3[%c0_2, %c0_3] : memref<8x1xi32, #tpu.memory_space<vmem>>, vector<8x1xi32>
    %5 = tpu.iota {dimensions = array<i32: 1>} : vector<8x32xi32>
    %cst = arith.constant -5.70378256 : f32
    %6 = vector.broadcast %cst : f32 to vector<8x32xf32>
    %7 = arith.subf %6, %3 : vector<8x32xf32>
    %cst_4 = arith.constant 0.00333333341 : f32
    %8 = vector.broadcast %cst_4 : f32 to vector<8x32xf32>
    %9 = arith.mulf %8, %7 : vector<8x32xf32>
    %cst_5 = arith.constant -0.105360515 : f32
    %10 = vector.broadcast %cst_5 : f32 to vector<8x32xf32>
    %11 = arith.subf %10, %3 : vector<8x32xf32>
    %cst_6 = arith.constant 0.899999976 : f32
    %12 = vector.broadcast %cst_6 : f32 to vector<8x32xf32>
    %13 = arith.mulf %12, %11 : vector<8x32xf32>
    %14 = vector.broadcast %4 : vector<8x1xi32> to vector<8x32xi32>
    %15 = arith.cmpi eq, %5, %14 : vector<8x32xi32>
    %16 = arith.select %15, %13, %9 : vector<8x32xi1>, vector<8x32xf32>
    %c0_i32_7 = arith.constant 0 : i32
    %17 = vector.broadcast %c0_i32_7 : i32 to vector<8x32xi32>
    %18 = arith.cmpi eq, %5, %17 : vector<8x32xi32>
    %cst_8 = arith.constant 0.000000e+00 : f32
    %19 = vector.broadcast %cst_8 : f32 to vector<8x32xf32>
    %20 = arith.select %18, %19, %16 : vector<8x32xi1>, vector<8x32xf32>
    %c0_i32_9 = arith.constant 0 : i32
    %21 = vector.broadcast %c0_i32_9 : i32 to vector<8x1xi32>
    %22 = arith.cmpi eq, %4, %21 : vector<8x1xi32>
    %cst_10 = arith.constant 0.000000e+00 : f32
    %23 = vector.shape_cast %22 : vector<8x1xi1> to vector<8x1xi1>
    %24 = vector.broadcast %23 : vector<8x1xi1> to vector<8x32xi1>
    %25 = vector.broadcast %cst_10 : f32 to vector<8x32xf32>
    %26 = arith.select %24, %25, %20 : vector<8x32xi1>, vector<8x32xf32>
    %c0_11 = arith.constant 0 : index
    %c0_12 = arith.constant 0 : index
    %27 = vector.load %arg5[%c0_11, %c0_12] : memref<8x32xf32, #tpu.memory_space<vmem>>, vector<8x32xf32>
    %28 = arith.addf %27, %26 : vector<8x32xf32>
    %c0_13 = arith.constant 0 : index
    %c0_14 = arith.constant 0 : index
    %29 = vector.load %arg5[%c0_13, %c0_14] : memref<8x32xf32, #tpu.memory_space<vmem>>, vector<8x32xf32>
    tpu.vector_store %arg5[%c0_13, %c0_14], %28 {strides = array<i32>} : memref<8x32xf32, #tpu.memory_space<vmem>>, vector<8x32xf32>,
    %c0_i32_15 = arith.constant 0 : i32
    %30 = arith.cmpi eq, %arg1, %c0_i32_15 : i32
    %31 = arith.extui %30 : i1 to i32
    %c0_i32_16 = arith.constant 0 : i32
    %32 = arith.cmpi ne, %31, %c0_i32_16 : i32
    scf.if %32 {
      %c0_17 = arith.constant 0 : index
      %c0_18 = arith.constant 0 : index
      %33 = vector.load %arg5[%c0_17, %c0_18] : memref<8x32xf32, #tpu.memory_space<vmem>>, vector<8x32xf32>
      %34 = vector.shape_cast %33 : vector<8x32xf32> to vector<1x8x32xf32>
      %cst_19 = arith.constant dense<0.000000e+00> : vector<1xf32>
      %35 = vector.multi_reduction <add>, %34, %cst_19 [1, 2] : vector<1x8x32xf32> to vector<1xf32>
      %36 = vector.shape_cast %35 : vector<1xf32> to vector<1x1x1xf32>
      %37 = vector.extract %36[0, 0, 0] : f32 from vector<1x1x1xf32>
      %38 = vector.broadcast %37 : f32 to vector<8x128xf32>
      %c0_20 = arith.constant 0 : index
      %c0_21 = arith.constant 0 : index
      %39 = vector.load %arg4[%c0_20, %c0_21] : memref<8x128xf32, #tpu.memory_space<vmem>>, vector<8x128xf32>
      tpu.vector_store %arg4[%c0_20, %c0_21], %38 {strides = array<i32>} : memref<8x128xf32, #tpu.memory_space<vmem>>, vector<8x128xf32>,
    } else {
    }
    return
  }
  func.func @transform_0(%arg0: i32, %arg1: i32) -> (i32, i32) {
    %c1_i32 = arith.constant 1 : i32
    %0 = arith.muli %arg0, %c1_i32 : i32
    %1 = arith.addi %0, %arg1 : i32
    %c0_i32 = arith.constant 0 : i32
    %c0_i32_0 = arith.constant 0 : i32
    return %1, %c0_i32 : i32, i32
  }
  func.func @transform_1(%arg0: i32, %arg1: i32) -> (i32, i32) {
    %c1_i32 = arith.constant 1 : i32
    %0 = arith.muli %arg0, %c1_i32 : i32
    %1 = arith.addi %0, %arg1 : i32
    %c0_i32 = arith.constant 0 : i32
    %c0_i32_0 = arith.constant 0 : i32
    return %1, %c0_i32 : i32, i32
  }
  func.func @transform_2(%arg0: i32, %arg1: i32) -> (i32, i32) {
    %c0_i32 = arith.constant 0 : i32
    %c0_i32_0 = arith.constant 0 : i32
    return %arg0, %c0_i32 : i32, i32
  }
}

</mosaic_0001>

<bundles_post_ra>
// kernel: tpu_custom_call.1
= control target key start
LH: loop header
LB: loop body
LE: loop exit
PB: predicated region body
PF: predicated region fallthrough
CT: control target
= control target key end

     0   :  { %7 = vsyncpa [#allocation4], 0  ;;  %s597_s0 = inlined_call_operand.vmem [shape: f32[16,32], index: 0, kind: input, shape index: {}]   ;;  %s598_s1 = inlined_call_operand.vmem [shape: s32[16,1], index: 1, kind: input, shape index: {}]   ;;  %s599_s2 = inlined_call_operand.hbm [shape: f32[16,128], index: 2, kind: output, shape index: {}]  }
   0x1   :  { %9 = vsyncpa [#allocation4 + $0x1], 0  ;;  %s494_s9 = smov 0   ;;  %s496_s10 = smov 0  }
   0x2   :  { %s498_s11 = smov 0   ;;  %s500_s12 = smov 0  }
   0x3   :  { %s502_s13 = smov 0   ;;  %s504_s14 = smov 0  }
   0x4 LB: > { %s325_s15 = sadd.s32 4294967295, %s475_s14   ;;  %s326_s16 = sadd.s32 4294967294, %s475_s14   ;;  %s475_s14 = sphi %s504_s14, %s15_s14   ;;  %s471_s13 = sphi %s502_s13, %s606_s13   ;;  %s467_s12 = sphi %s500_s12, %s605_s12   ;;  %s463_s11 = sphi %s498_s11, %s604_s11   ;;  %s459_s10 = sphi %s496_s10, %s603_s10   ;;  %s455_s9 = sphi %s494_s9, %s602_s9  }
   0x5   : > { %s27_s17 = sadd.s32 1, %s471_s13  ;;  %s90_s18 = sadd.s32 1, %s463_s11 }
   0x6   : > { %p29_p0 = scmp.ge.s32.totalorder %s27_s17, 2  ;;  %p100_p1 = scmp.ne.s32.totalorder %s463_s11, %s459_s10 }
   0x7   : > { %p101_p2 = scmp.eq.s32.totalorder %s325_s15, 1  ;;  %p106_p3 = scmp.ne.s32.totalorder %s459_s10, %s455_s9 }
   0x8   : > { %s608_s17 = smov (%p29_p0, %s27_s17), 0  ;;  %p107_p5 = scmp.eq.s32.totalorder %s326_s16, 1 }
   0x9   : > { %p534_p4 = por %p101_p2, %p100_p1  ;;  %s87_s20 = ssub.s32 %s471_s13, %s608_s17 }
   0xa   : > { %p329_p6 = scmp.ge.s32.totalorder %s475_s14, 1  ;;  %p88_p7 = scmp.eq.s32.totalorder %s87_s20, 0 }
   0xb   : > { %p541_p8 = por %p107_p5, %p106_p3  ;;  %p143_p9 = scmp.lt.s32.totalorder %s475_s14, 3 }
   0xc   : > { %s547_s22 = scalar_select %p88_p7, %s463_s11, %s90_s18  }
   0xd   : > { %p144_p10 = pnand %p329_p6, %p143_p9 }
   0xe   : > { %p171_p11 = scmp.lt.s32.totalorder (!%p144_p10), %s467_s12, 1  ;;  %s167_s3 = sand.u32 (!%p144_p10), 1, %s459_s10  }
   0xf   : > { %147 = sbr.rel (%p144_p10) target bundleno = 343 (0x157), region = 28  ;;  %s330_s4 = sshll.u32 (!%p144_p10), %s167_s3, 3 }
  0x10   : > { %s334_s5 = sshll.u32 (!%p144_p10), %s467_s12, 3  ;;  %s169_s15 = scalar_lea.vmem (!%p144_p10), [#allocation3], %s330_s4 }
  0x11   : > { %s241_s8 = scalar_lea.hbm (!%p144_p10), %s599_s2, %s334_s5  ;;  %s243_s16 = sshll.u32 (!%p144_p10), %s169_s15, 4  ;;  %s244_s16 = int_to_ptr.vmem [resolvable:$true] %s243_s16 }
  0x12   : > { %s245_s18 = sshll.u32 (!%p144_p10), %s241_s8, 4  ;;  %s246_s18 = int_to_ptr.hbm [resolvable:$true] %s245_s18 }
  0x14   : > { %v477_v0 = vmov 0   ;;  %s172_s23 = scalar_select %p171_p11, %s467_s12, 1  ;;  %vm186_vm1 = vcmask 261120   ;;  %v478_v3 = vmov 0.0   ;;  %v190_v5 = vlaneseq }
  0x15   : > { %396 = vset.pattern.permute.xlu0 %v477_v0  ;;  %187 = vst.msk [vmem:[#allocation2] sm:$0xff] %vm186_vm1, %v478_v3 }
  0x16   : > { %s331_s24 = sshll.u32 %s172_s23, 3  ;;  %v191_v8 = vand.u32 127, %v190_v5  ;;  %s231_s23 = scalar_lea.sflag [#allocation4], %s167_s3 }
  0x17   : > { %s180_s27 = scalar_lea.vmem %s598_s1, %s331_s24  ;;  %s174_s30 = scalar_lea.vmem %s597_s0, %s331_s24 }
  0x18   : > { %v189_v1 = vld [vmem:[%s180_s27] sm:$0xff]  ;;  %vm201_vm3 = vcmp.eq.s32.totalorder %v191_v8, 0  ;;  %s411_s24 = sshra.s32 %s246_s18, 4  ;;  %s417_s27 = scalar_lea.hbm %s599_s2, 16  ;;  %s412_s24 = int_to_ptr.hbm [resolvable:$true] %s411_s24 }
  0x19   : > { %197 = vperm.xlu0 %396, %v189_v1   ;;  %vm203_vm0 = vcmp.eq.s32.totalorder %v189_v1, 0  ;;  %v188_v4 = vld [vmem:[%s174_s30] sm:$0xff]  ;;  %s413_s25 = scalar_lea.hbm %s412_s24, 8  ;;  %p418_p1 = scmp.lt.s32.totalorder %s412_s24, %s599_s2 }
  0x1a   : > { %v204_v2 = vsel %vm203_vm0, 1, %v477_v0  ;;  %v192_v6 = vsub.f32 -5.7037826, %v188_v4  ;;  %v194_v7 = vsub.f32 -0.105360515, %v188_v4  ;;  %p414_p12 = scmp.ne.s32.totalorder %s412_s24, %s413_s25  ;;  %p419_p2 = scmp.lt.s32.totalorder %s417_s27, %s413_s25 }
  0x1c   : > { %v193_v10 = vmul.f32 0.0033333334, %v192_v6  ;;  %v195_v11 = vmul.f32 0.9, %v194_v7  ;;  %v210_v13 = vld [vmem:[#allocation2] sm:$0xff]  ;;  %p415_p13 = pnand %p414_p12, %p534_p4  ;;  %p420_p3 = por %p419_p2, %p418_p1 }
  0x1e   : > { %p416_p0 = pneg %p415_p13 }
  0x20   : > { %p421_p5 = pnand %p420_p3, %p416_p0 }
  0x21   : > { %206 = vperm.xlu0 %396, %v204_v2  }
  0x8b   : > { %v198_v9 = vpop.permute.xlu0 %197 }
  0x8c   : > { %vm199_vm2 = vcmp.eq.s32.totalorder %v191_v8, %v198_v9 }
  0x8d   : > { %v200_v12 = vsel %vm199_vm2, %v195_v11, %v193_v10 }
  0x8e   : > { %v202_v15 = vsel %vm201_vm3, 0.0, %v200_v12 }
  0x93   : > { %v207_v14 = vpop.permute.xlu0 %206 }
  0x94   : > { %vm208_vm4 = vcmp.eq.s32.totalorder %v207_v14, 1 }
  0x95   : > { %v209_v16 = vsel %vm208_vm4, 0.0, %v202_v15 }
  0x96   : > { %v211_v17 = vadd.f32 %v210_v13, %v209_v16 }
  0x98   : > { %213 = vst.msk [vmem:[#allocation2] sm:$0xff] %vm186_vm1, %v211_v17 }
  0x9f   : > { %v217_v18 = vld [vmem:[#allocation2] sm:$0xff] }
  0xa0   : > { %v218_v19 = vsel %vm186_vm1, %v217_v18, 0.0 }
  0xa1   : > { %219 = vadd.xlane.f32.xlu1 %v218_v19 }
 0x114   : > { %v220_v20 = vpop.xlane.xlu1 %219 }
 0x115   : > { %v221_v21 = vrot.slane %v220_v20, 4 }
 0x117   : > { %v222_v22 = vadd.f32 %v221_v21, %v220_v20 }
 0x119   : > { %v223_v23 = vrot.slane %v222_v22, 2 }
 0x11b   : > { %v224_v24 = vadd.f32 %v223_v23, %v222_v22 }
 0x11d   : > { %v225_v25 = vrot.slane %v224_v24, 1 }
 0x11f   : > { %v226_v26 = vadd.f32 %v225_v25, %v224_v24 }
 0x121   : > { %337 = vpush %v226_v26 }
 0x152   : > { %s338_s20 = spop %337 }
 0x153   : > { %v228_v27 = vstv %s338_s20 }
 0x154   : > { %229 = vst [vmem:[%s169_s15] sm:$0xff] %v228_v27 }
 0x155   : > { %424 = shalt.err (!%p421_p5)
}
 0x156   : > { %339 = dma.vmem_to_hbm [thread:$0]  (%p534_p4), %s244_s16, 128, %s246_s18, %s231_s23  }
 0x157 PF: > { %p345_p6 = scmp.ge.s32.totalorder %s475_s14, 2  ;;  %s257_s30 = sand.u32 1, %s455_s9  }
 0x158   : > { %s258_s3 = scalar_lea.sflag [#allocation4], %s257_s30 }
 0x159   : > { %p342_p7 = pnand %p345_p6, %p541_p8 }
 0x15b   : > { %p343_p9 = pneg %p342_p7 }
 0x15d   : > { %450 = dma.done.wait (%p343_p9), %s258_s3, 128  }
 0x15e   : > { %452 = vsyncadd (%p343_p9), %s258_s3, 4294967168  ;;  %s15_s14 = sadd.s32 1, %s475_s14   ;;  %s602_s9 = smov %s459_s10 }
 0x15f   : > { %p12_p10 = scmp.ge.s32.totalorder %s15_s14, 4   ;;  %s603_s10 = smov %s463_s11 }
 0x160   : > { %s604_s11 = smov %s547_s22  ;;  %s605_s12 = smov %s471_s13 }
 0x161   : > { %s606_s13 = smov %s608_s17  ;;  %14 = sbr.rel (!%p12_p10) target bundleno = 4 (0x4), region = 74 }
 0x166   :  { %264 = vsyncpa [#allocation4], 1 }
 0x167   :  { %266 = vsyncpa [#allocation4 + $0x1], 1 }

</bundles_post_ra>
